<compile_context>
chip_gen: v7x
topology: tpu7x:2x2x1
jax: 0.10.0
libtpu: 0.0.40
codegen_flags: <defaults>
</compile_context>

<pallas_src>
import jax
import jax.numpy as jnp
from jax.experimental import pallas as pl
from jax.experimental.pallas import tpu as pltpu


def _attention_kernel(enc_ref, wt_ref, bv_ref, ctx_ref, attw_ref):
    # enc_ref : (TB, S, H)  block of encoder_outputs for TB batch elements
    # wt_ref  : (H, H)      attention.weight, PRE-TRANSPOSED (== W^T)
    # bv_ref  : (2, H)      row 0 = attention.bias, row 1 = v.weight
    # ctx_ref : (1, TB, H)  context output block
    # attw_ref: (1, TB, S)  attention-weights output block
    tb, s, h = enc_ref.shape

    enc = enc_ref[...]                                    # (TB, S, H)
    wt = wt_ref[...]                                      # (H, H)
    b = bv_ref[0:1, :]                                    # (1, H)
    v = bv_ref[1:2, :]                                    # (1, H)

    # energy = tanh(enc @ W^T + b); flatten so the MXU sees M = TB*S rows.
    enc2d = enc.reshape(tb * s, h)
    energy = jnp.tanh(
        jnp.dot(enc2d, wt, preferred_element_type=jnp.float32) + b
    )                                                     # (TB*S, H)

    # scores = energy @ v^T, done as VPU multiply + lane reduction
    # (avoids an N=1 matmul and an extra XLU transpose).
    scores = jnp.sum(energy.reshape(tb, s, h) * v[None], axis=-1)   # (TB, S)

    # softmax over src_len
    m = jnp.max(scores, axis=-1, keepdims=True)           # (TB, 1)
    e = jnp.exp(scores - m)                               # (TB, S)
    denom = jnp.sum(e, axis=-1, keepdims=True)            # (TB, 1)
    r = pl.reciprocal(denom, approx=True)                 # EUP vrcp (free slot)
    r = r * (2.0 - denom * r)                             # one Newton step
    weights = e * r                                       # (TB, S)

    # context = weights @ enc, done as broadcast multiply + sublane reduction
    # over S (avoids an M=1 matmul that would serialize on the MXU).
    ctx = jnp.sum(weights[:, :, None] * enc.astype(jnp.float32), axis=1)  # (TB, H)

    ctx_ref[...] = ctx[None].astype(ctx_ref.dtype)        # (1, TB, H)
    attw_ref[...] = weights[None].astype(attw_ref.dtype)  # (1, TB, S)


def _pick_tb(B, S, H, itemsize, max_rows=512, vmem_budget=16 << 20):
    """Largest TB dividing B s.t. blocks fit VMEM, M=TB*S stays near the MXU
    sweet spot, and (for v7x's two TensorCores) the grid keeps >= 2 steps."""
    best = 1
    for d in range(1, B + 1):
        if B % d:
            continue
        if B >= 2 and B // d < 2:
            continue                      # keep both v7x TensorCores busy
        if d * S > max_rows:
            continue                      # past the 128/256-row MXU sweet spot
        # rough double-buffered per-step footprint (enc in, outputs, weights)
        need = (2 * itemsize * d * S * H
                + 2 * itemsize * d * (H + S)
                + itemsize * (H * H + 2 * H))
        if need > vmem_budget:
            continue
        best = d
    return best


def improved_attention(hidden, encoder_outputs, attn_w, attn_b, v_w, mask=None):
    """hidden: [B, H] (kept for API parity; the reference expands it but never
    uses it in the energy computation). encoder_outputs: [B, S, H]."""
    # TODO(synk): mask (masked_fill with -inf before softmax) not implemented.
    assert mask is None, "mask is not supported by this Pallas kernel"
    del hidden

    B, S, H = encoder_outputs.shape
    dtype = encoder_outputs.dtype
    itemsize = jnp.dtype(dtype).itemsize

    TB = _pick_tb(B, S, H, itemsize)
    G = B // TB

    # Pre-transpose W once on the host; pack bias + v into one (2, H) block.
    wt = attn_w.T
    bv = jnp.concatenate([attn_b.reshape(1, H), v_w.reshape(1, H)], axis=0)

    # Explicit VMEM limit: sized from the actual blocks, safe on v7x (64 MiB
    # physical) as well as v5e/v6e.
    need = (2 * itemsize * TB * S * H
            + 2 * itemsize * TB * (H + S)
            + 4 * (H * H + 2 * H))
    vmem_limit = int(min(32 << 20, max(16 << 20, 4 * need)))

    ctx, attw = pl.pallas_call(
        _attention_kernel,
        out_shape=(
            jax.ShapeDtypeStruct((G, TB, H), dtype),
            jax.ShapeDtypeStruct((G, TB, S), dtype),
        ),
        grid_spec=pltpu.PrefetchScalarGridSpec(
            num_scalar_prefetch=0,
            grid=(G,),
            in_specs=[
                pl.BlockSpec((TB, S, H), lambda i: (i, 0, 0)),   # encoder_outputs
                pl.BlockSpec((H, H), lambda i: (0, 0)),          # W^T (grid-invariant)
                pl.BlockSpec((2, H), lambda i: (0, 0)),          # [bias; v] (grid-invariant)
            ],
            out_specs=[
                pl.BlockSpec((1, TB, H), lambda i: (i, 0, 0)),   # context
                pl.BlockSpec((1, TB, S), lambda i: (i, 0, 0)),   # attention weights
            ],
        ),
        compiler_params=pltpu.CompilerParams(
            dimension_semantics=("parallel",),
            vmem_limit_bytes=vmem_limit,
        ),
    )(encoder_outputs, wt, bv)

    context = ctx.reshape(B, 1, H)
    weights = attw.reshape(B, S)
    return context, weights


def _reference(hidden, encoder_outputs, attn_w, attn_b, v_w):
    # pure-JAX reference mirroring the PyTorch forward (mask=None)
    energy = jnp.tanh(encoder_outputs @ attn_w.T + attn_b)        # (B,S,H)
    attention = (energy @ v_w.T)[..., 0]                          # (B,S)
    attention_weights = jax.nn.softmax(attention, axis=1)         # (B,S)
    context = jnp.einsum("bs,bsh->bh", attention_weights,
                         encoder_outputs)[:, None, :]             # (B,1,H)
    return context, attention_weights


if __name__ == "__main__":
    B, S, H = 8, 8, 32
    key = jax.random.PRNGKey(0)
    k1, k2, k3, k4, k5 = jax.random.split(key, 5)

    # deterministic parameter init (PyTorch Linear-style uniform(-1/sqrt(H), 1/sqrt(H)))
    bound = 1.0 / (H ** 0.5)
    attn_w = jax.random.uniform(k1, (H, H), jnp.float32, -bound, bound)
    attn_b = jax.random.uniform(k2, (H,), jnp.float32, -bound, bound)
    v_w = jax.random.uniform(k3, (1, H), jnp.float32, -bound, bound)

    hidden = jax.random.normal(k4, (B, H), jnp.float32)
    encoder_outputs = jax.random.normal(k5, (B, S, H), jnp.float32)

    context, weights = improved_attention(hidden, encoder_outputs,
                                          attn_w, attn_b, v_w)
    jax.block_until_ready((context, weights))

    ctx_ref, w_ref = _reference(hidden, encoder_outputs, attn_w, attn_b, v_w)
    assert context.shape == (B, 1, H)
    assert weights.shape == (B, S)
    assert jnp.allclose(context, ctx_ref, atol=1e-4, rtol=1e-4)
    assert jnp.allclose(weights, w_ref, atol=1e-4, rtol=1e-4)

    print("KERNEL_OK")
</pallas_src>

<mosaic_0001>
module attributes {stable_mosaic.version = 11 : i64} {
  func.func @_attention_kernel(%arg0: i32, %arg1: memref<4x8x32xf32, #tpu.memory_space<vmem>>, %arg2: memref<32x32xf32, #tpu.memory_space<vmem>>, %arg3: memref<2x32xf32, #tpu.memory_space<vmem>>, %arg4: memref<1x4x32xf32, #tpu.memory_space<vmem>>, %arg5: memref<1x4x8xf32, #tpu.memory_space<vmem>>) attributes {dimension_semantics = [#tpu.dimension_semantics<parallel>], iteration_bounds = array<i64: 2>, scalar_prefetch = 0 : i64, scratch_operands = 0 : i64, tpu.core_type = #tpu.core_type<tc>, window_params = [{transform_indices = @transform_0, window_bounds = array<i64: 4, 8, 32>}, {pipeline_mode = #tpu.pipeline_mode<synchronous>, transform_indices = @transform_1, window_bounds = array<i64: 32, 32>}, {pipeline_mode = #tpu.pipeline_mode<synchronous>, transform_indices = @transform_2, window_bounds = array<i64: 2, 32>}, {transform_indices = @transform_3, window_bounds = array<i64: 1, 4, 32>}, {transform_indices = @transform_4, window_bounds = array<i64: 1, 4, 8>}]} {
    %c0 = arith.constant 0 : index
    %c0_0 = arith.constant 0 : index
    %c0_1 = arith.constant 0 : index
    %0 = vector.load %arg1[%c0, %c0_0, %c0_1] : memref<4x8x32xf32, #tpu.memory_space<vmem>>, vector<4x8x32xf32>
    %c0_2 = arith.constant 0 : index
    %c0_3 = arith.constant 0 : index
    %1 = vector.load %arg2[%c0_2, %c0_3] : memref<32x32xf32, #tpu.memory_space<vmem>>, vector<32x32xf32>
    %c0_4 = arith.constant 0 : index
    %c0_5 = arith.constant 0 : index
    %2 = vector.load %arg3[%c0_4, %c0_5] : memref<2x32xf32, #tpu.memory_space<vmem>>, vector<1x32xf32>
    %c1 = arith.constant 1 : index
    %c0_6 = arith.constant 0 : index
    %3 = vector.load %arg3[%c1, %c0_6] : memref<2x32xf32, #tpu.memory_space<vmem>>, vector<1x32xf32>
    %4 = vector.shape_cast %0 : vector<4x8x32xf32> to vector<32x32xf32>
    %cst = arith.constant dense<0.000000e+00> : vector<32x32xf32>
    %5 = tpu.matmul %4, %1, %cst {dimension_numbers = #tpu.dot_dimension_numbers<[1], [0], [0], [1], [0, 0, 1, 1], [], []>} : vector<32x32xf32>, vector<32x32xf32>, vector<32x32xf32> -> vector<32x32xf32>
    %6 = vector.broadcast %2 : vector<1x32xf32> to vector<32x32xf32>
    %7 = arith.addf %5, %6 : vector<32x32xf32>
    %8 = math.tanh %7 : vector<32x32xf32>
    %9 = vector.shape_cast %8 : vector<32x32xf32> to vector<4x8x32xf32>
    %10 = vector.shape_cast %3 : vector<1x32xf32> to vector<1x1x32xf32>
    %11 = vector.broadcast %10 : vector<1x1x32xf32> to vector<4x8x32xf32>
    %12 = arith.mulf %9, %11 : vector<4x8x32xf32>
    %cst_7 = arith.constant dense<0.000000e+00> : vector<4x8xf32>
    %13 = vector.multi_reduction <add>, %12, %cst_7 [2] : vector<4x8x32xf32> to vector<4x8xf32>
    %cst_8 = arith.constant dense<0xFF800000> : vector<4xf32>
    %14 = vector.multi_reduction <maximumf>, %13, %cst_8 [1] : vector<4x8xf32> to vector<4xf32>
    %15 = vector.shape_cast %14 : vector<4xf32> to vector<4x1xf32>
    %16 = vector.broadcast %15 : vector<4x1xf32> to vector<4x8xf32>
    %17 = arith.subf %13, %16 : vector<4x8xf32>
    %18 = math.exp %17 : vector<4x8xf32>
    %cst_9 = arith.constant dense<0.000000e+00> : vector<4xf32>
    %19 = vector.multi_reduction <add>, %18, %cst_9 [1] : vector<4x8xf32> to vector<4xf32>
    %20 = vector.shape_cast %19 : vector<4xf32> to vector<4x1xf32>
    %21 = tpu.reciprocal %20 {approx = true} : vector<4x1xf32> -> vector<4x1xf32>
    %22 = arith.mulf %20, %21 : vector<4x1xf32>
    %cst_10 = arith.constant 2.000000e+00 : f32
    %23 = vector.broadcast %cst_10 : f32 to vector<4x1xf32>
    %24 = arith.subf %23, %22 : vector<4x1xf32>
    %25 = arith.mulf %21, %24 : vector<4x1xf32>
    %26 = vector.broadcast %25 : vector<4x1xf32> to vector<4x8xf32>
    %27 = arith.mulf %18, %26 : vector<4x8xf32>
    %28 = vector.shape_cast %27 : vector<4x8xf32> to vector<4x8x1xf32>
    %29 = vector.broadcast %28 : vector<4x8x1xf32> to vector<4x8x32xf32>
    %30 = arith.mulf %29, %0 : vector<4x8x32xf32>
    %cst_11 = arith.constant dense<0.000000e+00> : vector<4x32xf32>
    %31 = vector.multi_reduction <add>, %30, %cst_11 [1] : vector<4x8x32xf32> to vector<4x32xf32>
    %32 = vector.shape_cast %31 : vector<4x32xf32> to vector<1x4x32xf32>
    %c0_12 = arith.constant 0 : index
    %c0_13 = arith.constant 0 : index
    %c0_14 = arith.constant 0 : index
    %33 = vector.load %arg4[%c0_12, %c0_13, %c0_14] : memref<1x4x32xf32, #tpu.memory_space<vmem>>, vector<1x4x32xf32>
    tpu.vector_store %arg4[%c0_12, %c0_13, %c0_14], %32 {strides = array<i32>} : memref<1x4x32xf32, #tpu.memory_space<vmem>>, vector<1x4x32xf32>,
    %34 = vector.shape_cast %27 : vector<4x8xf32> to vector<1x4x8xf32>
    %c0_15 = arith.constant 0 : index
    %c0_16 = arith.constant 0 : index
    %c0_17 = arith.constant 0 : index
    %35 = vector.load %arg5[%c0_15, %c0_16, %c0_17] : memref<1x4x8xf32, #tpu.memory_space<vmem>>, vector<1x4x8xf32>
    tpu.vector_store %arg5[%c0_15, %c0_16, %c0_17], %34 {strides = array<i32>} : memref<1x4x8xf32, #tpu.memory_space<vmem>>, vector<1x4x8xf32>,
    return
  }
  func.func @transform_0(%arg0: i32) -> (i32, i32, i32) {
    %c0_i32 = arith.constant 0 : i32
    %c0_i32_0 = arith.constant 0 : i32
    %c0_i32_1 = arith.constant 0 : i32
    return %arg0, %c0_i32, %c0_i32_0 : i32, i32, i32
  }
  func.func @transform_1(%arg0: i32) -> (i32, i32) {
    %c0_i32 = arith.constant 0 : i32
    %c0_i32_0 = arith.constant 0 : i32
    %c0_i32_1 = arith.constant 0 : i32
    return %c0_i32, %c0_i32_0 : i32, i32
  }
  func.func @transform_2(%arg0: i32) -> (i32, i32) {
    %c0_i32 = arith.constant 0 : i32
    %c0_i32_0 = arith.constant 0 : i32
    %c0_i32_1 = arith.constant 0 : i32
    return %c0_i32, %c0_i32_0 : i32, i32
  }
  func.func @transform_3(%arg0: i32) -> (i32, i32, i32) {
    %c0_i32 = arith.constant 0 : i32
    %c0_i32_0 = arith.constant 0 : i32
    %c0_i32_1 = arith.constant 0 : i32
    return %arg0, %c0_i32, %c0_i32_0 : i32, i32, i32
  }
  func.func @transform_4(%arg0: i32) -> (i32, i32, i32) {
    %c0_i32 = arith.constant 0 : i32
    %c0_i32_0 = arith.constant 0 : i32
    %c0_i32_1 = arith.constant 0 : i32
    return %arg0, %c0_i32, %c0_i32_0 : i32, i32, i32
  }
}

</mosaic_0001>

<bundles_post_ra>
// kernel: tpu_custom_call.1
= control target key start
LH: loop header
LB: loop body
LE: loop exit
PB: predicated region body
PF: predicated region fallthrough
CT: control target
= control target key end

     0   :  { %10 = vsyncpa [#allocation3], 0  ;;  %s1391_s0 = inlined_call_operand.hbm [shape: f32[8,8,32], index: 0, kind: input, shape index: {}]   ;;  %s1392_s1 = inlined_call_operand.hbm [shape: f32[32,32], index: 1, kind: input, shape index: {}]   ;;  %s1393_s2 = inlined_call_operand.vmem [shape: f32[2,32], index: 2, kind: input, shape index: {}]   ;;  %s1394_s3 = inlined_call_operand.hbm [shape: f32[2,4,32], index: 3, kind: output, shape index: {0}]   ;;  %s1395_s4 = inlined_call_operand.hbm [shape: f32[2,4,8], index: 4, kind: output, shape index: {1}]  }
   0x1   :  { %12 = vsyncpa [#allocation3 + $0x1], 0 }
   0x2   :  { %13 = vsyncpa [#allocation6], 0 }
   0x3   :  { %14 = vsyncpa [#allocation4], 0 }
   0x4   :  { %16 = vsyncpa [#allocation4 + $0x1], 0 }
   0x5   :  { %17 = vsyncpa [#allocation9], 0 }
   0x6   :  { %19 = vsyncpa [#allocation9 + $0x1], 0  ;;  %s1078_s15 = smov 0   ;;  %s1080_s16 = smov 0  }
   0x7   :  { %s1082_s17 = smov 0   ;;  %s1084_s18 = smov 0  }
   0x8 LB: > { %s1099_s19 = sadd.s32 4294967295, %s1044_s18   ;;  %s740_s20 = sadd.s32 4294967294, %s1044_s18   ;;  %s1044_s18 = sphi %s1084_s18, %s1415_s18   ;;  %s1040_s17 = sphi %s1082_s17, %s1414_s17   ;;  %s1036_s16 = sphi %s1080_s16, %s1413_s16   ;;  %s1032_s15 = sphi %s1078_s15, %s1412_s15  }
   0x9   : > { %p45_p0 = scmp.ne.s32.totalorder %s1036_s16, %s1032_s15  ;;  %p1396_p1 = scmp.eq.s32.totalorder %s1099_s19, 0 }
   0xa   : > { %p117_p3 = scmp.eq.s32.totalorder %s740_s20, 1  ;;  %p741_p5 = scmp.ge.s32.totalorder %s1044_s18, 1 }
   0xb   : > { %p1108_p4 = por %p1396_p1, %p45_p0  ;;  %p150_p7 = scmp.lt.s32.totalorder %s1044_s18, 3 }
   0xc   : > { %p1113_p6 = por %p117_p3, %p45_p0  ;;  %s1046_s24 = smov [#allocation5]  }
   0xd   : > { %s1399_s21 = scalar_select %p1108_p4, 1, 0 }
   0xe   : > { %s1400_s22 = scalar_select %p1113_p6, 1, 0 }
   0xf   : > { %p1118_p8 = pnand %p741_p5, %p150_p7  ;;  %s162_s25 = sshll.u32 %s1046_s24, 4  ;;  %s1122_s25 = int_to_ptr.vmem [resolvable:$true] %s162_s25 }
  0x10   : > { %s1134_s27 = sadd.s32 1, %s1044_s18   ;;  %s32_s28 = sadd.s32 1, %s1040_s17 }
  0x11   : > { %s1401_s23 = scalar_select %p1118_p8, 1, 0 }
  0x12   : > { %p809_p9 = pneg %p1118_p8  ;;  %s29_s29 = ssub.s32 %s1044_s18, %s1134_s27 }
  0x13   : > { %s884_s6 = scalar_lea.hbm %s1392_s1, 512 }
  0x14   : > { %p1129_p11 = pnand %p809_p9, %p1396_p1  ;;  %p885_p12 = scmp.ne.s32.totalorder %s1392_s1, %s884_s6 }
  0x15   : > { %p891_p5 = scmp.lt.u32.totalorder %s884_s6, %s1392_s1 }
  0x16   : > { %p886_p13 = pneg %p1129_p11 }
  0x18   : > { %p887_p0 = pnand %p886_p13, %p885_p12 }
  0x1a   : > { %p888_p3 = pneg %p887_p0 }
  0x1c   : > { %p893_p7 = pnand %p891_p5, %p888_p3 }
  0x1e   : > { %896 = shalt.err (!%p893_p7)
}
  0x1f   : > { %s897_s11 = scalar_lea.vmem %s1122_s25, 512  ;;  %p905_p2 = scmp.lt.s32.totalorder %s1122_s25, %s1122_s25 }
  0x20   : > { %p898_p9 = scmp.ne.s32.totalorder %s1122_s25, %s897_s11  ;;  %p906_p6 = scmp.lt.s32.totalorder %s897_s11, %s897_s11 }
  0x22   : > { %p900_p10 = pnand %p898_p9, %p886_p13  ;;  %p907_p4 = por %p906_p6, %p905_p2 }
  0x24   : > { %p901_p1 = pneg %p900_p10 }
  0x26   : > { %p908_p8 = pnand %p907_p4, %p901_p1 }
  0x28   : > { %911 = shalt.err (!%p908_p8)
}
  0x29   : > { %s1047_s12 = smov 128   ;;  %s1048_s13 = smov 8  }
  0x2a   : > { %812 = dma.hbm_to_vmem [thread:$0]  (!%p1129_p11), %s1392_s1, 512, %s1122_s25, [#allocation6], %s1047_s12, %s1047_s12, %s1048_s13  }
  0x2b   : > { %p30_p1 = scmp.eq.s32.totalorder %s29_s29, 0  ;;  %p39_p2 = scmp.ne.s32.totalorder %s1040_s17, %s1036_s16 }
  0x2c   : > { %p40_p4 = scmp.eq.s32.totalorder %s1044_s18, 0  ;;  %p825_p6 = scmp.lt.s32.totalorder %s1044_s18, 2 }
  0x2d   : > { %s1168_s24 = scalar_select %p30_p1, %s1040_s17, %s32_s28  }
  0x2e   : > { %p41_p8 = por %p40_p4, %p39_p2  ;;  %p1403_p10 = scmp.eq.s32.totalorder %s1099_s19, 1 }
  0x2f   : > { %s179_s26 = sand.u32 1, %s1040_s17   ;;  %s764_s5 = sshll.u32 %s1044_s18, 9 }
  0x30   : > { %p1172_p12 = por %p1403_p10, %p39_p2  ;;  %s744_s6 = sshll.u32 %s179_s26, 5 }
  0x31   : > { %s1181_s9 = scalar_lea.hbm %s1391_s0, %s764_s5  ;;  %s183_s25 = scalar_lea.vmem [#allocation2], %s744_s6 }
  0x32   : > { %s190_s28 = sshll.u32 %s183_s25, 4  ;;  %p1183_p11 = pnand %p825_p6, %p41_p8  ;;  %s1187_s28 = int_to_ptr.vmem [resolvable:$true] %s190_s28 }
  0x33   : > { %s1189_s10 = scalar_lea.sflag [#allocation3], %s179_s26  ;;  %s912_s11 = scalar_lea.hbm %s1181_s9, 512 }
  0x34   : > { %p913_p13 = scmp.ne.s32.totalorder %s1181_s9, %s912_s11  ;;  %p914_p0 = pneg %p1183_p11 }
  0x35   : > { %s917_s5 = scalar_lea.hbm %s1391_s0, 1024  ;;  %p918_p7 = scmp.lt.u32.totalorder %s1181_s9, %s1391_s0 }
  0x36   : > { %p915_p3 = pnand %p914_p0, %p913_p13  ;;  %p919_p9 = scmp.lt.u32.totalorder %s917_s5, %s912_s11 }
  0x37   : > { %p921_p2 = scmp.lt.u32.totalorder %s912_s11, %s1181_s9 }
  0x38   : > { %p916_p5 = pneg %p915_p3  ;;  %p920_p1 = por %p919_p9, %p918_p7 }
  0x3a   : > { %p922_p4 = por %p921_p2, %p920_p1 }
  0x3c   : > { %p923_p6 = pnand %p922_p4, %p916_p5 }
  0x3e   : > { %926 = shalt.err (!%p923_p6)
}
  0x3f   : > { %s927_s26 = scalar_lea.vmem %s1187_s28, 512  ;;  %s1049_s8 = smov [#allocation2]  }
  0x40   : > { %p928_p8 = scmp.ne.s32.totalorder %s1187_s28, %s927_s26  ;;  %s932_s25 = sshll.u32 %s1049_s8, 4  ;;  %s933_s25 = int_to_ptr.vmem [resolvable:$false] %s932_s25 }
  0x41   : > { %s934_s14 = scalar_lea.vmem %s933_s25, 1024  ;;  %p935_p3 = scmp.lt.s32.totalorder %s1187_s28, %s933_s25 }
  0x42   : > { %p930_p10 = pnand %p928_p8, %p914_p0  ;;  %p936_p7 = scmp.lt.s32.totalorder %s934_s14, %s927_s26 }
  0x44   : > { %p931_p13 = pneg %p930_p10  ;;  %p937_p9 = por %p936_p7, %p935_p3 }
  0x46   : > { %p938_p1 = pnand %p937_p9, %p931_p13 }
  0x48   : > { %941 = shalt.err (!%p938_p1)
}
  0x49   : > { %816 = dma.hbm_to_vmem [thread:$0]  (!%p1183_p11), %s1181_s9, 512, %s1187_s28, %s1189_s10, %s1047_s12, %s1047_s12, %s1048_s13  }
  0x4a   : > { %p1406_p0 = scmp.ne.s32.totalorder %s1401_s23, 0 }
  0x4b   : > { %s1223_s11 = sand.u32 (!%p1406_p0), 1, %s1036_s16   ;;  %p1407_p5 = scmp.ne.s32.totalorder (!%p1406_p0), %s1399_s21, 0 }
  0x4c   : > { %202 = sbr.rel (%p1406_p0) target bundleno = 1123 (0x463), region = 32  ;;  %s748_s20 = sshll.u32 (!%p1406_p0), %s1223_s11, 5 }
  0x4d   : > { %s205_s5 = scalar_lea.sflag (!%p1406_p0), [#allocation3], %s1223_s11  ;;  %s208_s6 = scalar_lea.vmem (!%p1406_p0), [#allocation2], %s748_s20 }
  0x53   : > { %1015 = dma.done.wait (%p1407_p5), %s205_s5, 512  }
  0x54   : > { %1017 = vsyncadd (%p1407_p5), %s205_s5, 4294966784  ;;  %p1408_p2 = scmp.eq.s32.totalorder %s1099_s19, 0 }
  0x56   : > { %1019 = dma.done.wait (%p1408_p2), [#allocation6], 512   ;;  %p1409_p11 = pmov %p1408_p2 }
  0x57   : > { %vm257_vm0 = vcmask 261120   ;;  %v247_v0 = vld [vmem:[#allocation5] sm:$0xff]  ;;  %v248_v1 = vld [vmem:[#allocation5 + $0x8] sm:$0xff]  ;;  %v249_v2 = vld [vmem:[#allocation5 + $0x10] sm:$0xff]  ;;  %v383_v32 = vlaneseq  ;;  %vm401_vm1 = vcmask 1041409   ;;  %vm403_vm2 = vcmask 1042434  }
  0x58   : > { %1021 = vsyncadd (%p1409_p11), [#allocation6], 4294966784  ;;  %v787_v3 = vpack.c.bf16 %v248_v1, %v247_v0  ;;  %v250_v4 = vld [vmem:[#allocation5 + $0x18] sm:$0xff]  ;;  %v1235_v5 = vld [vmem:[%s208_s6] sm:$0xff]  ;;  %vm405_vm3 = vcmask 1043459   ;;  %vm408_vm4 = vcmask 60416  }
  0x59   : > { %v1237_v6 = vld [vmem:[%s208_s6 + $0x10] sm:$0xff]  ;;  %v791_v7 = vpack.c.bf16 %v250_v4, %v249_v2  ;;  %781 = vmatprep.mubr.msk.f32.mxu0 %vm257_vm0, %v1235_v5  ;;  %v1243_v8 = vld [vmem:[%s208_s6 + $0x8] sm:$0xff]  ;;  %v1245_v9 = vld [vmem:[%s208_s6 + $0x18] sm:$0xff]  ;;  %v384_v33 = vand.u32 127, %v383_v32  ;;  %v1261_v34 = vshrl.u32 %v383_v32, 7  ;;  %v1050_v48 = vmov 0  }
  0x5a   : > { %784 = vmatprep.mubr.msk.f32.mxu1 %vm257_vm0, %v1237_v6  ;;  %788 = vmatprep.subr.bf16.mxu0 %v787_v3  ;;  %v752_v10 = vld [vmem:[%s1393_s2] ss:$0 sm:$0xff]  ;;  %v757_v20 = vld [vmem:[%s1393_s2 + $0x1] ss:$0 sm:$0xff]  ;;  %s750_s9 = sshll.u32 %s1223_s11, 2  ;;  %s760_s28 = sshll.u32 %s1099_s19, 6 }
  0x5b   : > { %795 = vmatprep.subr.bf16.mxu1 %v787_v3  ;;  %790 = vmatpush3.bf16.msra.mxu0 %v787_v3  ;;  %v1264_v36 = vsub.s32 %v384_v33, %v1261_v34  ;;  %v415_v49 = vsub.s32 0, %v1261_v34  ;;  %v419_v50 = vsub.s32 1, %v1261_v34  ;;  %v423_v51 = vsub.s32 2, %v1261_v34  ;;  %s241_s29 = scalar_lea.vmem [#allocation8], %s750_s9  ;;  %s1308_s8 = scalar_lea.hbm %s1395_s4, %s760_s28 }
  0x5c   : > { %797 = vmatpush3.bf16.msra.mxu1 %v787_v3  ;;  %792 = vmatprep.subr.bf16.mxu0 %v791_v7  ;;  %v427_v52 = vsub.s32 3, %v1261_v34  ;;  %s628_s10 = sshll.u32 %s241_s29, 4  ;;  %s602_s25 = scalar_lea.sflag [#allocation9], %s1223_s11  ;;  %s1310_s10 = int_to_ptr.vmem [resolvable:$true] %s628_s10 }
  0x5d   : > { %796 = vmatprep.subr.bf16.mxu1 %v791_v7  ;;  %865 = vset.pattern.permute.xlu0 %v1050_v48  ;;  %s942_s14 = scalar_lea.vmem %s1310_s10, 64  ;;  %s1051_s20 = smov [#allocation8]  }
  0x5e   : > { %864 = vset.pattern.permute.xlu1 %v1050_v48  ;;  %p943_p4 = scmp.ne.s32.totalorder %s1310_s10, %s942_s14  ;;  %s946_s5 = sshll.u32 %s1051_s20, 4  ;;  %s947_s5 = int_to_ptr.vmem [resolvable:$false] %s946_s5 }
  0x5f   : > { %794 = vmatpush3.bf16.msra.mxu0 %v791_v7  ;;  %s948_s6 = scalar_lea.vmem %s947_s5, 128  ;;  %p949_p10 = scmp.lt.s32.totalorder %s1310_s10, %s947_s5 }
  0x60   : > { %798 = vmatpush3.bf16.msra.mxu1 %v791_v7  ;;  %p944_p6 = pnand %p943_p4, %p1172_p12  ;;  %p950_p13 = scmp.lt.s32.totalorder %s948_s6, %s942_s14 }
  0x62   : > { %782 = vmatmul.mubr.msk.f32.vlgmr.msra.gmra.mrb[0].mxu0 %vm257_vm0, %v1243_v8  ;;  %p945_p8 = pneg %p944_p6  ;;  %p951_p3 = por %p950_p13, %p949_p10 }
  0x63   : > { %785 = vmatmul.mubr.msk.f32.vlgmr.msra.gmra.mrb[0].mxu1 %vm257_vm0, %v1245_v9 }
  0x64   : > { %p952_p7 = pnand %p951_p3, %p945_p8 }
 0x135   : > { %v783_v11 = vpop.f32.mrb[0].mxu0 }
 0x136   : > { %v786_v12 = vpop.f32.mrb[0].mxu1  ;;  %v342_v13 = vadd.f32 %v783_v11, %v752_v10  ;;  %v336_v15 = vpop.f32.mrb[1].mxu0 }
 0x137   : > { %v352_v14 = vadd.f32 %v786_v12, %v752_v10  ;;  %v346_v16 = vpop.f32.mrb[1].mxu1  ;;  %v337_v17 = vadd.f32 %v752_v10, %v336_v15 }
 0x138   : > { %v347_v18 = vadd.f32 %v752_v10, %v346_v16  ;;  %866 = vtanh.f32 %v342_v13 }
 0x139   : > { %868 = vtanh.f32 %v352_v14 }
 0x13a   : > { %870 = vtanh.f32 %v337_v17 }
 0x13b   : > { %872 = vtanh.f32 %v347_v18 }
 0x142   : > { %v867_v19 = vpop.eup %866 }
 0x143   : > { %v869_v21 = vpop.eup %868  ;;  %v364_v27 = vmul.f32 %v867_v19, %v757_v20 }
 0x144   : > { %v871_v22 = vpop.eup %870  ;;  %v366_v29 = vmul.f32 %v869_v21, %v757_v20 }
 0x145   : > { %v873_v23 = vpop.eup %872  ;;  %v363_v24 = vmul.f32 %v871_v22, %v757_v20  ;;  %v370_v30 = vsel %vm257_vm0, %v364_v27, 0.0 }
 0x146   : > { %v365_v25 = vmul.f32 %v873_v23, %v757_v20  ;;  %v376_v31 = vsel %vm257_vm0, %v366_v29, 0.0 }
 0x147   : > { %v367_v26 = vsel %vm257_vm0, %v363_v24, 0.0 }
 0x148   : > { %v373_v28 = vsel %vm257_vm0, %v365_v25, 0.0  ;;  %368 = vadd.xlane.f32.xlu0 %v367_v26 }
 0x149   : > { %374 = vadd.xlane.f32.xlu1 %v373_v28 }
 0x14c   : > { %371 = vadd.xlane.f32.xlu0 %v370_v30 }
 0x14d   : > { %377 = vadd.xlane.f32.xlu1 %v376_v31 }
 0x1d5   : > { %v369_v35 = vpop.xlane.xlu0 %368 }
 0x1d6   : > { %v375_v37 = vpop.xlane.xlu1 %374  ;;  %v388_v39 = vrot.slane %v369_v35, %v1264_v36 }
 0x1d7   : > { %v396_v42 = vrot.slane %v375_v37, %v1264_v36 }
 0x1d9   : > { %v372_v38 = vpop.xlane.xlu0 %371 }
 0x1da   : > { %v378_v40 = vpop.xlane.xlu1 %377  ;;  %v392_v41 = vrot.slane %v372_v38, %v1264_v36 }
 0x1db   : > { %v400_v43 = vrot.slane %v378_v40, %v1264_v36 }
 0x1dc   : > { %v402_v44 = vsel %vm401_vm1, %v392_v41, %v388_v39 }
 0x1dd   : > { %v404_v45 = vsel %vm403_vm2, %v396_v42, %v402_v44 }
 0x1de   : > { %v406_v46 = vsel %vm405_vm3, %v400_v43, %v404_v45 }
 0x1df   : > { %v409_v47 = vsel %vm408_vm4, %v406_v46, -inf }
 0x1e0   : > { %410 = vmax.xlane.f32.xlu0 %v409_v47 }
 0x26d   : > { %v411_v53 = vpop.xlane.xlu0 %410 }
 0x26e   : > { %v416_v54 = vrot.slane %v411_v53, %v415_v49  ;;  %v420_v55 = vrot.slane %v411_v53, %v419_v50  ;;  %v424_v56 = vrot.slane %v411_v53, %v423_v51  ;;  %v428_v57 = vrot.slane %v411_v53, %v427_v52 }
 0x270   : > { %v433_v58 = vsub.f32 %v369_v35, %v416_v54  ;;  %v434_v59 = vsub.f32 %v372_v38, %v420_v55  ;;  %v435_v60 = vsub.f32 %v375_v37, %v424_v56  ;;  %v436_v63 = vsub.f32 %v378_v40, %v428_v57 }
 0x272   : > { %v437_v61 = vmul.f32 1.442695, %v433_v58  ;;  %v439_v62 = vmul.f32 1.442695, %v434_v59  ;;  %v441_v0 = vmul.f32 1.442695, %v435_v60 }
 0x273   : > { %v443_v1 = vmul.f32 1.442695, %v436_v63 }
 0x274   : > { %874 = vpow2.f32 %v437_v61 }
 0x275   : > { %876 = vpow2.f32 %v439_v62 }
 0x276   : > { %878 = vpow2.f32 %v441_v0 }
 0x277   : > { %880 = vpow2.f32 %v443_v1 }
 0x27e   : > { %v875_v2 = vpop.eup %874 }
 0x27f   : > { %v877_v3 = vpop.eup %876  ;;  %450 = vperm.xlu1 %864, %v875_v2  }
 0x280   : > { %453 = vperm.xlu0 %865, %v877_v3   ;;  %v879_v4 = vpop.eup %878 }
 0x281   : > { %v881_v7 = vpop.eup %880 }
 0x283   : > { %456 = vperm.xlu1 %864, %v879_v4  }
 0x287   : > { %459 = vperm.xlu1 %864, %v881_v7  }
 0x2fe   : > { %v451_v10 = vpop.permute.xlu1 %450 }
 0x2ff   : > { %v454_v11 = vpop.permute.xlu0 %453  ;;  %v464_v14 = vrot.slane %v451_v10, %v1264_v36 }
 0x300   : > { %v468_v13 = vrot.slane %v454_v11, %v1264_v36 }
 0x302   : > { %v457_v12 = vpop.permute.xlu1 %456  ;;  %v477_v17 = vsel %vm401_vm1, %v468_v13, %v464_v14 }
 0x303   : > { %v472_v15 = vrot.slane %v457_v12, %v1264_v36 }
 0x305   : > { %v478_v19 = vsel %vm403_vm2, %v472_v15, %v477_v17 }
 0x306   : > { %v460_v16 = vpop.permute.xlu1 %459 }
 0x307   : > { %v476_v18 = vrot.slane %v460_v16, %v1264_v36 }
 0x309   : > { %v479_v20 = vsel %vm405_vm3, %v476_v18, %v478_v19 }
 0x30a   : > { %v481_v21 = vsel %vm408_vm4, %v479_v20, 0.0 }
 0x30b   : > { %482 = vadd.xlane.f32.xlu1 %v481_v21 }
 0x398   : > { %v483_v22 = vpop.xlane.xlu1 %482 }
 0x399   : > { %882 = vrcp.f32 %v483_v22 }
 0x3a3   : > { %v883_v23 = vpop.eup %882 }
 0x3a4   : > { %v485_v24 = vmul.f32 %v883_v23, %v483_v22 }
 0x3a6   : > { %v486_v25 = vsub.f32 2.0, %v485_v24 }
 0x3a8   : > { %v487_v26 = vmul.f32 %v883_v23, %v486_v25 }
 0x3aa   : > { %v492_v27 = vrot.slane %v487_v26, %v415_v49  ;;  %v496_v29 = vrot.slane %v487_v26, %v419_v50  ;;  %v500_v31 = vrot.slane %v487_v26, %v423_v51  ;;  %v504_v33 = vrot.slane %v487_v26, %v427_v52 }
 0x3ac   : > { %v509_v28 = vmul.f32 %v875_v2, %v492_v27  ;;  %v510_v30 = vmul.f32 %v877_v3, %v496_v29  ;;  %v511_v32 = vmul.f32 %v879_v4, %v500_v31  ;;  %v512_v34 = vmul.f32 %v881_v7, %v504_v33 }
 0x3ae   : > { %515 = vperm.xlu0 %865, %v509_v28  }
 0x3b2   : > { %520 = vperm.xlu0 %865, %v510_v30  }
 0x3b6   : > { %525 = vperm.xlu0 %865, %v511_v32  }
 0x3ba   : > { %530 = vperm.xlu0 %865, %v512_v34  }
 0x42d   : > { %v516_v35 = vpop.permute.xlu0 %515 }
 0x42e   : > { %v533_v37 = vmul.f32 %v516_v35, %v1235_v5  ;;  %v578_v49 = vrot.slane %v516_v35, %v1264_v36 }
 0x430   : > { %v537_v38 = vsel %vm257_vm0, %v533_v37, 0.0 }
 0x431   : > { %v538_v39 = vrot.slane %v537_v38, 4  ;;  %v521_v40 = vpop.permute.xlu0 %520 }
 0x432   : > { %v534_v41 = vmul.f32 %v521_v40, %v1243_v8  ;;  %v582_v46 = vrot.slane %v521_v40, %v1264_v36 }
 0x433   : > { %v539_v43 = vadd.f32 %v538_v39, %v537_v38 }
 0x434   : > { %v544_v42 = vsel %vm257_vm0, %v534_v41, 0.0  ;;  %v591_v54 = vsel %vm401_vm1, %v582_v46, %v578_v49 }
 0x435   : > { %v545_v44 = vrot.slane %v544_v42, 4  ;;  %v526_v45 = vpop.permute.xlu0 %525  ;;  %v540_v8 = vrot.slane %v539_v43, 2 }
 0x436   : > { %v535_v47 = vmul.f32 %v526_v45, %v1237_v6  ;;  %v586_v5 = vrot.slane %v526_v45, %v1264_v36 }
 0x437   : > { %v546_v48 = vadd.f32 %v545_v44, %v544_v42 }
 0x438   : > { %v551_v50 = vsel %vm257_vm0, %v535_v47, 0.0  ;;  %v592_v58 = vsel %vm403_vm2, %v586_v5, %v591_v54 }
 0x439   : > { %v547_v51 = vrot.slane %v546_v48, 2  ;;  %v552_v52 = vrot.slane %v551_v50, 4  ;;  %v531_v53 = vpop.permute.xlu0 %530 }
 0x43a   : > { %v536_v6 = vmul.f32 %v531_v53, %v1245_v9  ;;  %v590_v55 = vrot.slane %v531_v53, %v1264_v36  ;;  %v541_v36 = vadd.f32 %v540_v8, %v539_v43 }
 0x43b   : > { %v548_v56 = vadd.f32 %v547_v51, %v546_v48  ;;  %v553_v57 = vadd.f32 %v552_v52, %v551_v50 }
 0x43c   : > { %v558_v9 = vsel %vm257_vm0, %v536_v6, 0.0  ;;  %v593_v59 = vsel %vm405_vm3, %v590_v55, %v592_v58 }
 0x43d   : > { %v554_v60 = vrot.slane %v553_v57, 2  ;;  %v559_v61 = vrot.slane %v558_v9, 4  ;;  %595 = vst.msk [vmem:[%s241_s29] sm:$0xf] %vm408_vm4, %v593_v59 }
 0x43e   : > { %955 = shalt.err (!%p952_p7)
}
 0x43f   : > { %s956_s21 = scalar_lea.hbm %s1308_s8, 64  ;;  %s960_s13 = scalar_lea.hbm %s1395_s4, 128 }
 0x440   : > { %p957_p9 = scmp.ne.s32.totalorder %s1308_s8, %s956_s21  ;;  %p961_p5 = scmp.lt.u32.totalorder %s1308_s8, %s1395_s4 }
 0x441   : > { %p962_p2 = scmp.lt.u32.totalorder %s960_s13, %s956_s21  ;;  %p964_p4 = scmp.lt.u32.totalorder %s956_s21, %s1308_s8 }
 0x442   : > { %p958_p1 = pnand %p957_p9, %p1172_p12 }
 0x443   : > { %p963_p11 = por %p962_p2, %p961_p5 }
 0x444   : > { %p959_p0 = pneg %p958_p1 }
 0x445   : > { %p965_p6 = por %p964_p4, %p963_p11 }
 0x447   : > { %p966_p8 = pnand %p965_p6, %p959_p0 }
 0x449   : > { %969 = shalt.err (!%p966_p8)
}
 0x44a   : > { %806 = dma.vmem_to_hbm [thread:$0]  (%p1172_p12), %s1310_s10, 64, %s1308_s8, %s602_s25   ;;  %v549_v62 = vrot.slane %v548_v56, 1  ;;  %v555_v63 = vadd.f32 %v554_v60, %v553_v57  ;;  %v560_v0 = vadd.f32 %v559_v61, %v558_v9  ;;  %v542_v1 = vrot.slane %v541_v36, 1 }
 0x44b   : > { %s234_s26 = scalar_lea.vmem [#allocation7], %s750_s9  ;;  %vm573_vm5 = vcmask 257024   ;;  %s1346_s25 = scalar_lea.hbm %s1394_s3, %s760_s28 }
 0x44c   : > { %v556_v2 = vrot.slane %v555_v63, 1  ;;  %v561_v3 = vrot.slane %v560_v0, 2  ;;  %v550_v4 = vadd.f32 %v549_v62, %v548_v56  ;;  %v543_v11 = vadd.f32 %v542_v1, %v541_v36  ;;  %s615_s14 = sshll.u32 %s234_s26, 4  ;;  %s597_s9 = scalar_lea.sflag [#allocation4], %s1223_s11  ;;  %s1348_s14 = int_to_ptr.vmem [resolvable:$true] %s615_s14 }
 0x44d   : > { %s970_s20 = scalar_lea.vmem %s1348_s14, 64  ;;  %s1052_s19 = smov [#allocation7]  }
 0x44e   : > { %v562_v7 = vadd.f32 %v561_v3, %v560_v0  ;;  %v557_v10 = vadd.f32 %v556_v2, %v555_v63  ;;  %v569_v13 = vsel %vm401_vm1, %v550_v4, %v543_v11  ;;  %p971_p10 = scmp.ne.s32.totalorder %s1348_s14, %s970_s20  ;;  %s974_s5 = sshll.u32 %s1052_s19, 4  ;;  %s975_s5 = int_to_ptr.vmem [resolvable:$false] %s974_s5 }
 0x44f   : > { %s976_s6 = scalar_lea.vmem %s975_s5, 128  ;;  %p977_p7 = scmp.lt.s32.totalorder %s1348_s14, %s975_s5 }
 0x450   : > { %v563_v12 = vrot.slane %v562_v7, 1  ;;  %v570_v15 = vsel %vm403_vm2, %v557_v10, %v569_v13  ;;  %p972_p13 = pnand %p971_p10, %p1172_p12  ;;  %p978_p9 = scmp.lt.s32.totalorder %s976_s6, %s970_s20 }
 0x452   : > { %v564_v14 = vadd.f32 %v563_v12, %v562_v7  ;;  %p973_p3 = pneg %p972_p13  ;;  %p979_p1 = por %p978_p9, %p977_p7 }
 0x454   : > { %v571_v16 = vsel %vm405_vm3, %v564_v14, %v570_v15  ;;  %p980_p0 = pnand %p979_p1, %p973_p3 }
 0x455   : > { %574 = vst.msk [vmem:[%s234_s26] sm:$0xf] %vm573_vm5, %v571_v16 }
 0x456   : > { %983 = shalt.err (!%p980_p0)
}
 0x457   : > { %s984_s11 = scalar_lea.hbm %s1346_s25, 64  ;;  %s988_s23 = scalar_lea.hbm %s1394_s3, 128 }
 0x458   : > { %p985_p5 = scmp.ne.s32.totalorder %s1346_s25, %s984_s11  ;;  %p989_p4 = scmp.lt.u32.totalorder %s1346_s25, %s1394_s3 }
 0x459   : > { %p990_p6 = scmp.lt.u32.totalorder %s988_s23, %s984_s11  ;;  %p992_p10 = scmp.lt.u32.totalorder %s984_s11, %s1346_s25 }
 0x45a   : > { %p986_p2 = pnand %p985_p5, %p1172_p12 }
 0x45b   : > { %p991_p8 = por %p990_p6, %p989_p4 }
 0x45c   : > { %p987_p11 = pneg %p986_p2 }
 0x45d   : > { %p993_p13 = por %p992_p10, %p991_p8 }
 0x45f   : > { %p994_p3 = pnand %p993_p13, %p987_p11 }
 0x461   : > { %997 = shalt.err (!%p994_p3)
}
 0x462   : > { %805 = dma.vmem_to_hbm [thread:$0]  (%p1172_p12), %s1348_s14, 64, %s1346_s25, %s597_s9  }
 0x463 PF: > { %s640_s29 = sand.u32 1, %s1032_s15   ;;  %p1410_p7 = scmp.ne.s32.totalorder %s1400_s22, 0 }
 0x464   : > { %p1411_p9 = scmp.ge.s32.totalorder %s1044_s18, 2  ;;  %s641_s7 = scalar_lea.sflag [#allocation4], %s640_s29 }
 0x466   : > { %p818_p1 = pnand %p1411_p9, %p1410_p7 }
 0x468   : > { %1023 = dma.done.wait (!%p818_p1), %s641_s7, 64  }
 0x469   : > { %1025 = vsyncadd (!%p818_p1), %s641_s7, 4294967232  ;;  %s650_s26 = scalar_lea.sflag [#allocation9], %s640_s29 }
 0x46a   : > { %1027 = dma.done.wait (!%p818_p1), %s650_s26, 64  }
 0x46b   : > { %1029 = vsyncadd (!%p818_p1), %s650_s26, 4294967232  ;;  %p22_p12 = scmp.ge.s32.totalorder %s1134_s27, 4   ;;  %s1412_s15 = smov %s1036_s16 }
 0x46c   : > { %s1413_s16 = smov %s1040_s17  ;;  %s1414_s17 = smov %s1168_s24 }
 0x46d   : > { %s1415_s18 = smov %s1134_s27  ;;  %24 = sbr.rel (!%p22_p12) target bundleno = 8 (0x8), region = 98 }
 0x474   :  { %655 = vsyncpa [#allocation3], 1 }
 0x475   :  { %657 = vsyncpa [#allocation3 + $0x1], 1 }
 0x476   :  { %658 = vsyncpa [#allocation6], 1 }
 0x477   :  { %659 = vsyncpa [#allocation4], 1 }
 0x478   :  { %661 = vsyncpa [#allocation4 + $0x1], 1 }
 0x479   :  { %662 = vsyncpa [#allocation9], 1 }
 0x47a   :  { %664 = vsyncpa [#allocation9 + $0x1], 1 }

</bundles_post_ra>
